<compile_context>
chip_gen: v7x
topology: tpu7x:2x2x1
jax: 0.10.0
libtpu: 0.0.40
codegen_flags: <defaults>
</compile_context>

<pallas_src>
import functools

import jax
import jax.numpy as jnp
from jax import lax
from jax.experimental import pallas as pl
from jax.experimental.pallas import tpu as pltpu

_LANES = 128
_SUBLANES = 8
_NUM_CORE_CHUNKS = 2      # leading "parallel" grid axis (v7x megacore)
_MAX_TILE_ROWS = 1024     # 1024 x 128 x 4B = 512 KiB per input per buffer


def _smooth_l1(pred, targ):
    # SmoothL1 with beta=1 (PyTorch default): 0.5*d^2 if |d|<1 else |d|-0.5
    d = pred - targ
    ad = jnp.abs(d)
    return jnp.where(ad < 1.0, 0.5 * d * d, ad - 0.5)


def _normalize_ab(x):
    # _nomalize_ab: x/128 then clamp to [-1, 1]   (1/128 is exact in binary)
    return jnp.clip(x * (1.0 / 128.0), -1.0, 1.0)


def _color_loss_kernel(*refs, tile_rows, tiles_per_core, n_valid, normalize,
                       has_fine):
    if has_fine:
        coarse_ref, fine_ref, targ_ref, acc_c_ref, acc_f_ref = refs
    else:
        coarse_ref, targ_ref, acc_c_ref = refs
        fine_ref = acc_f_ref = None

    step = pl.program_id(1)          # "arbitrary" reduction axis

    @pl.when(step == 0)
    def _init():
        acc_c_ref[...] = jnp.zeros_like(acc_c_ref)
        if has_fine:
            acc_f_ref[...] = jnp.zeros_like(acc_f_ref)

    # Logical (unclamped) block index -> global element index of every lane.
    # Everything past n_valid (tail of the partial last block, wrapper pad,
    # and fully-out-of-range duplicate blocks from the clamped index_map)
    # contributes exactly zero.  Pure VPU work, hidden under the DMA.
    block = pl.program_id(0) * tiles_per_core + step
    base = block * (tile_rows * _LANES)
    idx = (base
           + lax.broadcasted_iota(jnp.int32, (tile_rows, _LANES), 0) * _LANES
           + lax.broadcasted_iota(jnp.int32, (tile_rows, _LANES), 1))
    valid = idx < n_valid

    t = targ_ref[...].astype(jnp.float32)
    c = coarse_ref[...].astype(jnp.float32)

    # coarse branch is never normalized (matches the PyTorch module)
    val_c = jnp.where(valid, _smooth_l1(c, t), 0.0)
    acc_c_ref[...] += (val_c.reshape(-1, _SUBLANES, _LANES).sum(axis=0)
                       .reshape(1, _SUBLANES, _LANES))

    if has_fine:
        f = fine_ref[...].astype(jnp.float32)
        if normalize:
            val_f = _smooth_l1(_normalize_ab(f), _normalize_ab(t))
        else:
            val_f = _smooth_l1(f, t)
        val_f = jnp.where(valid, val_f, 0.0)
        acc_f_ref[...] += (val_f.reshape(-1, _SUBLANES, _LANES).sum(axis=0)
                           .reshape(1, _SUBLANES, _LANES))


def _flatten_rows(x):
    """Flatten to a lane-dense (rows, 128) slab.

    Free (pure reshape, no HBM copy) when x.size % 128 == 0 and rows >= 8;
    otherwise falls back to a minimal zero pad (copy) — correctness is still
    guaranteed by the in-kernel mask against the true element count.
    """
    flat = x.reshape(-1)
    n = flat.shape[0]
    rem = n % _LANES
    if rem:
        flat = jnp.pad(flat, (0, _LANES - rem))
    rows = flat.shape[0] // _LANES
    if rows < _SUBLANES:   # tiny inputs only
        flat = jnp.pad(flat, (0, (_SUBLANES - rows) * _LANES))
    return flat.reshape(-1, _LANES)


def _smooth_l1_sums(coarse, fine, targets, *, normalize,
                    max_tile_rows=_MAX_TILE_ROWS):
    """Returns (sum_coarse, sum_fine|None) of SmoothL1 over all elements."""
    assert coarse.size == targets.size
    has_fine = fine is not None
    if has_fine:
        assert fine.size == targets.size

    n_valid = int(targets.size)            # static: shapes are compile-time

    c2 = _flatten_rows(coarse)
    t2 = _flatten_rows(targets)
    ins = [c2]
    if has_fine:
        ins.append(_flatten_rows(fine))
    ins.append(t2)

    rows = t2.shape[0]                                   # >= 8, multiple of 1
    tile_rows = min(max_tile_rows, (rows // _SUBLANES) * _SUBLANES)
    n_tiles = pl.cdiv(rows, tile_rows)
    tiles_per_core = pl.cdiv(n_tiles, _NUM_CORE_CHUNKS)

    def in_map(c, i):
        # clamp so duplicate (fully masked) blocks never index out of range
        return (jnp.minimum(c * tiles_per_core + i, n_tiles - 1), 0)

    in_specs = [pl.BlockSpec((tile_rows, _LANES), in_map) for _ in ins]

    acc_shape = jax.ShapeDtypeStruct(
        (_NUM_CORE_CHUNKS, _SUBLANES, _LANES), jnp.float32)
    acc_spec = pl.BlockSpec((1, _SUBLANES, _LANES), lambda c, i: (c, 0, 0))

    if has_fine:
        out_shape = (acc_shape, acc_shape)
        out_specs = (acc_spec, acc_spec)
    else:
        out_shape = acc_shape
        out_specs = acc_spec

    kernel = functools.partial(
        _color_loss_kernel,
        tile_rows=tile_rows,
        tiles_per_core=tiles_per_core,
        n_valid=n_valid,
        normalize=normalize,
        has_fine=has_fine)

    out = pl.pallas_call(
        kernel,
        out_shape=out_shape,
        grid_spec=pltpu.PrefetchScalarGridSpec(
            num_scalar_prefetch=0,
            grid=(_NUM_CORE_CHUNKS, tiles_per_core),
            in_specs=in_specs,
            out_specs=out_specs,
        ),
        compiler_params=pltpu.CompilerParams(
            dimension_semantics=("parallel", "arbitrary"),
        ),
    )(*ins)

    if has_fine:
        acc_c, acc_f = out
        return jnp.sum(acc_c), jnp.sum(acc_f)
    return jnp.sum(out), None


def color_loss(inputs, targets, coef=1.0, prefix="rgb", suffix="",
               normalize=False):
    """JAX/Pallas equivalent of ColorLoss.forward."""
    coarse = inputs[f"{prefix}_coarse{suffix}"]
    fine = inputs[f"{prefix}_fine{suffix}"] if f"{prefix}_fine" in inputs else None

    sum_c, sum_f = _smooth_l1_sums(coarse, fine, targets, normalize=normalize)

    inv_n = 1.0 / jnp.float32(targets.size)
    loss = sum_c * inv_n
    if sum_f is not None:
        loss = loss + sum_f * inv_n
    return coef * loss


if __name__ == "__main__":
    key = jax.random.PRNGKey(0)
    k1, k2, k3 = jax.random.split(key, 3)

    # small NeRF-ish shapes: (batch=2, n_rays=256, rgb=3)
    shape = (2, 256, 3)
    rgb_coarse = jax.random.uniform(k1, shape, dtype=jnp.float32)
    rgb_fine = jax.random.uniform(k2, shape, dtype=jnp.float32)
    targets = jax.random.uniform(k3, shape, dtype=jnp.float32)
    inputs = {"rgb_coarse": rgb_coarse, "rgb_fine": rgb_fine}

    # pure-JAX reference of the PyTorch module
    def ref_sl1_mean(p, t):
        d = p - t
        ad = jnp.abs(d)
        return jnp.mean(jnp.where(ad < 1.0, 0.5 * d * d, ad - 0.5))

    def ref_color_loss(inp, tgt, coef=1.0, normalize=False):
        loss = ref_sl1_mean(inp["rgb_coarse"], tgt)
        if "rgb_fine" in inp:
            if not normalize:
                loss = loss + ref_sl1_mean(inp["rgb_fine"], tgt)
            else:
                nrm = lambda x: jnp.clip(x / 128.0, -1.0, 1.0)
                loss = loss + ref_sl1_mean(nrm(inp["rgb_fine"]), nrm(tgt))
        return coef * loss

    # fused coarse + fine
    loss = color_loss(inputs, targets, coef=1.0)
    jax.block_until_ready(loss)
    assert jnp.allclose(loss, ref_color_loss(inputs, targets),
                        rtol=1e-5, atol=1e-6), loss

    # normalize=True path (only the fine branch is /128 + clamped)
    loss_n = color_loss(inputs, targets, coef=2.0, normalize=True)
    assert jnp.allclose(loss_n,
                        ref_color_loss(inputs, targets, coef=2.0, normalize=True),
                        rtol=1e-5, atol=1e-6), loss_n

    # coarse-only path
    loss_c = color_loss({"rgb_coarse": rgb_coarse}, targets)
    assert jnp.allclose(loss_c,
                        ref_color_loss({"rgb_coarse": rgb_coarse}, targets),
                        rtol=1e-5, atol=1e-6), loss_c

    # larger ragged shape: exercises multi-tile grid, core split, partial last
    # block, clamped duplicate block, and the 128-pad fallback.
    shape2 = (2, 50000, 3)
    kk = jax.random.split(jax.random.PRNGKey(1), 3)
    inputs2 = {"rgb_coarse": jax.random.uniform(kk[0], shape2, dtype=jnp.float32),
               "rgb_fine": jax.random.uniform(kk[1], shape2, dtype=jnp.float32)}
    targets2 = jax.random.uniform(kk[2], shape2, dtype=jnp.float32)
    loss2 = color_loss(inputs2, targets2, coef=1.0, normalize=True)
    jax.block_until_ready(loss2)
    assert jnp.allclose(loss2, ref_color_loss(inputs2, targets2, normalize=True),
                        rtol=1e-4, atol=1e-6), loss2

    print("KERNEL_OK")
</pallas_src>

<mosaic_0001>
module attributes {stable_mosaic.version = 11 : i64} {
  func.func @_color_loss_kernel(%arg0: i32, %arg1: i32, %arg2: memref<8x128xf32, #tpu.memory_space<vmem>>, %arg3: memref<8x128xf32, #tpu.memory_space<vmem>>, %arg4: memref<8x128xf32, #tpu.memory_space<vmem>>, %arg5: memref<1x8x128xf32, #tpu.memory_space<vmem>>, %arg6: memref<1x8x128xf32, #tpu.memory_space<vmem>>) attributes {dimension_semantics = [#tpu.dimension_semantics<parallel>, #tpu.dimension_semantics<arbitrary>], iteration_bounds = array<i64: 2, 1>, scalar_prefetch = 0 : i64, scratch_operands = 0 : i64, tpu.core_type = #tpu.core_type<tc>, window_params = [{transform_indices = @transform_0, window_bounds = array<i64: 8, 128>}, {transform_indices = @transform_1, window_bounds = array<i64: 8, 128>}, {transform_indices = @transform_2, window_bounds = array<i64: 8, 128>}, {transform_indices = @transform_3, window_bounds = array<i64: 1, 8, 128>}, {transform_indices = @transform_4, window_bounds = array<i64: 1, 8, 128>}]} {
    %c0_i32 = arith.constant 0 : i32
    %0 = arith.cmpi eq, %arg1, %c0_i32 : i32
    %1 = arith.extui %0 : i1 to i32
    %c0_i32_0 = arith.constant 0 : i32
    %2 = arith.cmpi ne, %1, %c0_i32_0 : i32
    scf.if %2 {
      %cst_27 = arith.constant 0.000000e+00 : f32
      %54 = vector.broadcast %cst_27 : f32 to vector<1x8x128xf32>
      %c0_28 = arith.constant 0 : index
      %c0_29 = arith.constant 0 : index
      %c0_30 = arith.constant 0 : index
      %55 = vector.load %arg5[%c0_28, %c0_29, %c0_30] : memref<1x8x128xf32, #tpu.memory_space<vmem>>, vector<1x8x128xf32>
      tpu.vector_store %arg5[%c0_28, %c0_29, %c0_30], %54 {strides = array<i32>} : memref<1x8x128xf32, #tpu.memory_space<vmem>>, vector<1x8x128xf32>,
      %cst_31 = arith.constant 0.000000e+00 : f32
      %56 = vector.broadcast %cst_31 : f32 to vector<1x8x128xf32>
      %c0_32 = arith.constant 0 : index
      %c0_33 = arith.constant 0 : index
      %c0_34 = arith.constant 0 : index
      %57 = vector.load %arg6[%c0_32, %c0_33, %c0_34] : memref<1x8x128xf32, #tpu.memory_space<vmem>>, vector<1x8x128xf32>
      tpu.vector_store %arg6[%c0_32, %c0_33, %c0_34], %56 {strides = array<i32>} : memref<1x8x128xf32, #tpu.memory_space<vmem>>, vector<1x8x128xf32>,
    } else {
    }
    %c1_i32 = arith.constant 1 : i32
    %3 = arith.muli %arg0, %c1_i32 : i32
    %4 = arith.addi %3, %arg1 : i32
    %c1024_i32 = arith.constant 1024 : i32
    %5 = arith.muli %4, %c1024_i32 : i32
    %6 = tpu.iota {dimensions = array<i32: 0>} : vector<8x128xi32>
    %c128_i32 = arith.constant 128 : i32
    %7 = vector.broadcast %c128_i32 : i32 to vector<8x128xi32>
    %8 = arith.muli %6, %7 : vector<8x128xi32>
    %9 = vector.broadcast %5 : i32 to vector<8x128xi32>
    %10 = arith.addi %9, %8 : vector<8x128xi32>
    %11 = tpu.iota {dimensions = array<i32: 1>} : vector<8x128xi32>
    %12 = arith.addi %10, %11 : vector<8x128xi32>
    %c1536_i32 = arith.constant 1536 : i32
    %13 = vector.broadcast %c1536_i32 : i32 to vector<8x128xi32>
    %14 = arith.cmpi slt, %12, %13 : vector<8x128xi32>
    %c0 = arith.constant 0 : index
    %c0_1 = arith.constant 0 : index
    %15 = vector.load %arg4[%c0, %c0_1] : memref<8x128xf32, #tpu.memory_space<vmem>>, vector<8x128xf32>
    %c0_2 = arith.constant 0 : index
    %c0_3 = arith.constant 0 : index
    %16 = vector.load %arg2[%c0_2, %c0_3] : memref<8x128xf32, #tpu.memory_space<vmem>>, vector<8x128xf32>
    %17 = arith.subf %16, %15 : vector<8x128xf32>
    %18 = math.absf %17 : vector<8x128xf32>
    %cst = arith.constant 1.000000e+00 : f32
    %19 = vector.broadcast %cst : f32 to vector<8x128xf32>
    %20 = arith.cmpf olt, %18, %19 : vector<8x128xf32>
    %cst_4 = arith.constant 5.000000e-01 : f32
    %21 = vector.broadcast %cst_4 : f32 to vector<8x128xf32>
    %22 = arith.mulf %21, %17 : vector<8x128xf32>
    %23 = arith.mulf %22, %17 : vector<8x128xf32>
    %cst_5 = arith.constant 5.000000e-01 : f32
    %24 = vector.broadcast %cst_5 : f32 to vector<8x128xf32>
    %25 = arith.subf %18, %24 : vector<8x128xf32>
    %26 = arith.select %20, %23, %25 : vector<8x128xi1>, vector<8x128xf32>
    %cst_6 = arith.constant 0.000000e+00 : f32
    %27 = vector.broadcast %cst_6 : f32 to vector<8x128xf32>
    %28 = arith.select %14, %26, %27 : vector<8x128xi1>, vector<8x128xf32>
    %c0_7 = arith.constant 0 : index
    %c0_8 = arith.constant 0 : index
    %c0_9 = arith.constant 0 : index
    %29 = vector.load %arg5[%c0_7, %c0_8, %c0_9] : memref<1x8x128xf32, #tpu.memory_space<vmem>>, vector<1x8x128xf32>
    %30 = vector.shape_cast %28 : vector<8x128xf32> to vector<1x8x128xf32>
    %cst_10 = arith.constant dense<0.000000e+00> : vector<8x128xf32>
    %31 = vector.multi_reduction <add>, %30, %cst_10 [0] : vector<1x8x128xf32> to vector<8x128xf32>
    %32 = vector.shape_cast %31 : vector<8x128xf32> to vector<1x8x128xf32>
    %33 = arith.addf %29, %32 : vector<1x8x128xf32>
    %c0_11 = arith.constant 0 : index
    %c0_12 = arith.constant 0 : index
    %c0_13 = arith.constant 0 : index
    %34 = vector.load %arg5[%c0_11, %c0_12, %c0_13] : memref<1x8x128xf32, #tpu.memory_space<vmem>>, vector<1x8x128xf32>
    tpu.vector_store %arg5[%c0_11, %c0_12, %c0_13], %33 {strides = array<i32>} : memref<1x8x128xf32, #tpu.memory_space<vmem>>, vector<1x8x128xf32>,
    %c0_14 = arith.constant 0 : index
    %c0_15 = arith.constant 0 : index
    %35 = vector.load %arg3[%c0_14, %c0_15] : memref<8x128xf32, #tpu.memory_space<vmem>>, vector<8x128xf32>
    %36 = arith.subf %35, %15 : vector<8x128xf32>
    %37 = math.absf %36 : vector<8x128xf32>
    %cst_16 = arith.constant 1.000000e+00 : f32
    %38 = vector.broadcast %cst_16 : f32 to vector<8x128xf32>
    %39 = arith.cmpf olt, %37, %38 : vector<8x128xf32>
    %cst_17 = arith.constant 5.000000e-01 : f32
    %40 = vector.broadcast %cst_17 : f32 to vector<8x128xf32>
    %41 = arith.mulf %40, %36 : vector<8x128xf32>
    %42 = arith.mulf %41, %36 : vector<8x128xf32>
    %cst_18 = arith.constant 5.000000e-01 : f32
    %43 = vector.broadcast %cst_18 : f32 to vector<8x128xf32>
    %44 = arith.subf %37, %43 : vector<8x128xf32>
    %45 = arith.select %39, %42, %44 : vector<8x128xi1>, vector<8x128xf32>
    %cst_19 = arith.constant 0.000000e+00 : f32
    %46 = vector.broadcast %cst_19 : f32 to vector<8x128xf32>
    %47 = arith.select %14, %45, %46 : vector<8x128xi1>, vector<8x128xf32>
    %c0_20 = arith.constant 0 : index
    %c0_21 = arith.constant 0 : index
    %c0_22 = arith.constant 0 : index
    %48 = vector.load %arg6[%c0_20, %c0_21, %c0_22] : memref<1x8x128xf32, #tpu.memory_space<vmem>>, vector<1x8x128xf32>
    %49 = vector.shape_cast %47 : vector<8x128xf32> to vector<1x8x128xf32>
    %cst_23 = arith.constant dense<0.000000e+00> : vector<8x128xf32>
    %50 = vector.multi_reduction <add>, %49, %cst_23 [0] : vector<1x8x128xf32> to vector<8x128xf32>
    %51 = vector.shape_cast %50 : vector<8x128xf32> to vector<1x8x128xf32>
    %52 = arith.addf %48, %51 : vector<1x8x128xf32>
    %c0_24 = arith.constant 0 : index
    %c0_25 = arith.constant 0 : index
    %c0_26 = arith.constant 0 : index
    %53 = vector.load %arg6[%c0_24, %c0_25, %c0_26] : memref<1x8x128xf32, #tpu.memory_space<vmem>>, vector<1x8x128xf32>
    tpu.vector_store %arg6[%c0_24, %c0_25, %c0_26], %52 {strides = array<i32>} : memref<1x8x128xf32, #tpu.memory_space<vmem>>, vector<1x8x128xf32>,
    return
  }
  func.func @transform_0(%arg0: i32, %arg1: i32) -> (i32, i32) {
    %c1_i32 = arith.constant 1 : i32
    %0 = arith.muli %arg0, %c1_i32 : i32
    %1 = arith.addi %0, %arg1 : i32
    %c1_i32_0 = arith.constant 1 : i32
    %2 = arith.minsi %1, %c1_i32_0 : i32
    %c0_i32 = arith.constant 0 : i32
    %c0_i32_1 = arith.constant 0 : i32
    return %2, %c0_i32 : i32, i32
  }
  func.func @transform_1(%arg0: i32, %arg1: i32) -> (i32, i32) {
    %c1_i32 = arith.constant 1 : i32
    %0 = arith.muli %arg0, %c1_i32 : i32
    %1 = arith.addi %0, %arg1 : i32
    %c1_i32_0 = arith.constant 1 : i32
    %2 = arith.minsi %1, %c1_i32_0 : i32
    %c0_i32 = arith.constant 0 : i32
    %c0_i32_1 = arith.constant 0 : i32
    return %2, %c0_i32 : i32, i32
  }
  func.func @transform_2(%arg0: i32, %arg1: i32) -> (i32, i32) {
    %c1_i32 = arith.constant 1 : i32
    %0 = arith.muli %arg0, %c1_i32 : i32
    %1 = arith.addi %0, %arg1 : i32
    %c1_i32_0 = arith.constant 1 : i32
    %2 = arith.minsi %1, %c1_i32_0 : i32
    %c0_i32 = arith.constant 0 : i32
    %c0_i32_1 = arith.constant 0 : i32
    return %2, %c0_i32 : i32, i32
  }
  func.func @transform_3(%arg0: i32, %arg1: i32) -> (i32, i32, i32) {
    %c0_i32 = arith.constant 0 : i32
    %c0_i32_0 = arith.constant 0 : i32
    %c0_i32_1 = arith.constant 0 : i32
    return %arg0, %c0_i32, %c0_i32_0 : i32, i32, i32
  }
  func.func @transform_4(%arg0: i32, %arg1: i32) -> (i32, i32, i32) {
    %c0_i32 = arith.constant 0 : i32
    %c0_i32_0 = arith.constant 0 : i32
    %c0_i32_1 = arith.constant 0 : i32
    return %arg0, %c0_i32, %c0_i32_0 : i32, i32, i32
  }
}

</mosaic_0001>

<bundles_post_ra>
// kernel: tpu_custom_call.1
= control target key start
LH: loop header
LB: loop body
LE: loop exit
PB: predicated region body
PF: predicated region fallthrough
CT: control target
= control target key end

     0   :  { %s1277_s0 = inlined_call_operand.hbm [shape: f32[12,128], index: 0, kind: input, shape index: {}]   ;;  %s1278_s1 = inlined_call_operand.hbm [shape: f32[12,128], index: 1, kind: input, shape index: {}]   ;;  %s1279_s2 = inlined_call_operand.hbm [shape: f32[12,128], index: 2, kind: input, shape index: {}]   ;;  %s1280_s3 = inlined_call_operand.hbm [shape: f32[2,8,128], index: 3, kind: output, shape index: {0}]   ;;  %s1281_s4 = inlined_call_operand.hbm [shape: f32[2,8,128], index: 4, kind: output, shape index: {1}]  }
   0x1   :  { %1291 = sst [smem:[#allocation21_spill]] %s1278_s1 }
   0x2   :  { %10 = vsyncpa [#allocation3], 0 }
   0x3   :  { %12 = vsyncpa [#allocation3 + $0x1], 0 }
   0x4   :  { %13 = vsyncpa [#allocation6], 0 }
   0x5   :  { %15 = vsyncpa [#allocation6 + $0x1], 0 }
   0x6   :  { %16 = vsyncpa [#allocation4], 0 }
   0x7   :  { %18 = vsyncpa [#allocation4 + $0x1], 0 }
   0x8   :  { %19 = vsyncpa [#allocation10], 0 }
   0x9   :  { %21 = vsyncpa [#allocation10 + $0x1], 0  ;;  %s963_s15 = smov 0   ;;  %s965_s16 = smov 0  }
   0xa   :  { %s967_s17 = smov 0   ;;  %s969_s18 = smov 0  }
   0xb   :  { %s971_s19 = smov 0   ;;  %s973_s20 = smov 0  }
   0xc   :  { %s975_s21 = smov 0   ;;  %s977_s22 = smov 0  }
   0xd   :  { %s979_s23 = smov 0  }
   0xe LB: > { %1292 = sst [smem:[#allocation15_spill]] %s907_s17  ;;  %s1007_s24 = sadd.s32 4294967295, %s931_s23   ;;  %s931_s23 = sphi %s979_s23, %s27_s23   ;;  %s927_s22 = sphi %s977_s22, %s1320_s22   ;;  %s923_s21 = sphi %s975_s21, %s1319_s21   ;;  %s919_s20 = sphi %s973_s20, %s1318_s20   ;;  %s915_s19 = sphi %s971_s19, %s1324_s19   ;;  %s911_s18 = sphi %s969_s18, %s1323_s18   ;;  %s907_s17 = sphi %s967_s17, %s1316_s17   ;;  %s903_s16 = sphi %s965_s16, %s1322_s16   ;;  %s899_s15 = sphi %s963_s15, %s1321_s15  }
   0xf   : > { %1293 = sst [smem:[#allocation16_spill]] %s919_s20  ;;  %s573_s25 = sadd.s32 4294967294, %s931_s23  }
  0x10   : > { %1294 = sst [smem:[#allocation17_spill]] %s927_s22  ;;  %s39_s26 = sadd.s32 1, %s927_s22 }
  0x11   : > { %p44_p0 = scmp.lt.s32.totalorder %s927_s22, 1  ;;  %p41_p1 = scmp.ge.s32.totalorder %s39_s26, 2 }
  0x12   : > { %s52_s27 = sadd.s32 1, %s919_s20  ;;  %p59_p2 = scmp.ne.s32.totalorder %s919_s20, %s915_s19 }
  0x13   : > { %s45_s28 = scalar_select %p44_p0, %s927_s22, 1 }
  0x14   : > { %s1326_s26 = smov (%p41_p1, %s39_s26), 0  ;;  %p60_p3 = scmp.eq.s32.totalorder %s931_s23, 0 }
  0x15   : > { %1295 = sst [smem:[#allocation18_spill]] %s1326_s26  ;;  %p47_p4 = scmp.lt.s32.totalorder %s1326_s26, 1 }
  0x16   : > { %p65_p5 = scmp.ne.s32.totalorder %s915_s19, %s911_s18  ;;  %p1021_p6 = por %p60_p3, %p59_p2 }
  0x17   : > { %p66_p7 = scmp.eq.s32.totalorder %s1007_s24, 0  ;;  %s139_s6 = ssub.s32 %s927_s22, %s1326_s26 }
  0x18   : > { %s48_s30 = scalar_select %p47_p4, %s1326_s26, 1 }
  0x19   : > { %p1027_p8 = por %p66_p7, %p65_p5  ;;  %p140_p9 = scmp.eq.s32.totalorder %s139_s6, 0 }
  0x1a   : > { %s49_s7 = ssub.s32 %s45_s28, %s48_s30  ;;  %s142_s8 = sadd.s32 1, %s907_s17 }
  0x1b   : > { %s1297_s5 = scalar_select %p1027_p8, 1, 0 }
  0x1c   : > { %p50_p10 = scmp.eq.s32.totalorder %s49_s7, 0  ;;  %p152_p11 = scmp.ne.s32.totalorder %s907_s17, %s903_s16 }
  0x1d   : > { %s1035_s9 = scalar_select %p140_p9, %s907_s17, %s142_s8  }
  0x1e   : > { %s1038_s10 = scalar_select %p50_p10, %s919_s20, %s52_s27  }
  0x1f   : > { %1298 = sst [smem:[#allocation19_spill]] %s1035_s9  ;;  %p153_p12 = scmp.eq.s32.totalorder %s1007_s24, 1 }
  0x20   : > { %1299 = sst [smem:[#allocation20_spill]] %s1038_s10  ;;  %p158_p13 = scmp.ne.s32.totalorder %s903_s16, %s899_s15 }
  0x21   : > { %p159_p0 = scmp.eq.s32.totalorder %s573_s25, 1  ;;  %p1045_p1 = por %p153_p12, %p152_p11 }
  0x22   : > { %p624_p4 = scmp.lt.s32.totalorder %s931_s23, 2  ;;  %s1282_s13 = sand.u32 1, %s919_s20  }
  0x23   : > { %s1300_s11 = scalar_select %p1045_p1, 1, 0 }
  0x24   : > { %p1050_p3 = por %p159_p0, %p158_p13  ;;  %s1056_s14 = sshll.u32 %s45_s28, 7 }
  0x25   : > { %s1060_s18 = sshll.u32 %s1282_s13, 3  ;;  %p1064_p5 = pnand %p624_p4, %p1021_p6 }
  0x26   : > { %s1301_s12 = scalar_select %p1050_p3, 1, 0 }
  0x27   : > { %s1302_s25 = scalar_select %p1064_p5, 1, 0 }
  0x28   : > { %s226_s27 = sand.u32 1, %s931_s23   ;;  %s1303_s1 = sld [smem:[#allocation21_spill]] }
  0x29   : > { %s230_s28 = scalar_lea.vmem [#allocation5], %s1060_s18  ;;  %s1079_s29 = scalar_lea.sflag [#allocation6], %s226_s27 }
  0x2a   : > { %s240_s8 = sshll.u32 %s230_s28, 4  ;;  %p1085_p9 = pneg %p1064_p5  ;;  %s1076_s8 = int_to_ptr.vmem [resolvable:$true] %s240_s8 }
  0x2e   : > { %s1073_s7 = scalar_lea.hbm %s1303_s1, %s1056_s14  ;;  %s704_s28 = scalar_lea.hbm %s1303_s1, 256 }
  0x2f   : > { %s699_s13 = scalar_lea.hbm %s1073_s7, 128  ;;  %p705_p12 = scmp.lt.u32.totalorder %s1073_s7, %s1303_s1 }
  0x30   : > { %p700_p6 = scmp.ne.s32.totalorder %s1073_s7, %s699_s13  ;;  %p706_p13 = scmp.lt.u32.totalorder %s704_s28, %s699_s13 }
  0x31   : > { %p708_p4 = scmp.lt.u32.totalorder %s699_s13, %s1073_s7 }
  0x32   : > { %p702_p10 = pnand %p1085_p9, %p700_p6  ;;  %p707_p0 = por %p706_p13, %p705_p12 }
  0x34   : > { %p703_p11 = pneg %p702_p10  ;;  %p709_p2 = por %p708_p4, %p707_p0 }
  0x36   : > { %p710_p7 = pnand %p709_p2, %p703_p11 }
  0x38   : > { %713 = shalt.err (!%p710_p7)
}
  0x39   : > { %s714_s27 = scalar_lea.vmem %s1076_s8, 128  ;;  %s933_s30 = smov [#allocation5]  }
  0x3a   : > { %p715_p6 = scmp.ne.s32.totalorder %s1076_s8, %s714_s27  ;;  %s719_s6 = sshll.u32 %s933_s30, 4  ;;  %s720_s6 = int_to_ptr.vmem [resolvable:$false] %s719_s6 }
  0x3b   : > { %s721_s22 = scalar_lea.vmem %s720_s6, 256  ;;  %p722_p1 = scmp.lt.s32.totalorder %s1076_s8, %s720_s6 }
  0x3c   : > { %p717_p10 = pnand %p715_p6, %p1085_p9  ;;  %p723_p8 = scmp.lt.s32.totalorder %s721_s22, %s714_s27 }
  0x3e   : > { %p718_p3 = pneg %p717_p10  ;;  %p724_p12 = por %p723_p8, %p722_p1 }
  0x40   : > { %p725_p13 = pnand %p724_p12, %p718_p3 }
  0x42   : > { %728 = shalt.err (!%p725_p13)
}
  0x43   : > { %613 = dma.hbm_to_vmem [thread:$0]  (!%p1064_p5), %s1073_s7, 128, %s1076_s8, %s1079_s29  }
  0x44   : > { %p266_p2 = scmp.lt.s32.totalorder %s931_s23, 3  ;;  %p1305_p7 = scmp.ge.s32.totalorder %s931_s23, 1 }
  0x45   : > { %s1120_s27 = scalar_lea.hbm %s1277_s0, %s1056_s14  ;;  %s209_s30 = scalar_lea.vmem [#allocation2], %s1060_s18 }
  0x46   : > { %p1112_p11 = pnand %p1305_p7, %p266_p2  ;;  %s219_s6 = sshll.u32 %s209_s30, 4  ;;  %s220_s6 = int_to_ptr.vmem [resolvable:$true] %s219_s6 }
  0x47   : > { %s1307_s22 = sand.u32 1, %s919_s20   ;;  %s729_s8 = scalar_lea.hbm %s1120_s27, 128 }
  0x48   : > { %s1306_s10 = scalar_select %p1112_p11, 1, 0 }
  0x49   : > { %s206_s7 = scalar_lea.sflag [#allocation3], %s1307_s22  ;;  %p730_p8 = scmp.ne.s32.totalorder %s1120_s27, %s729_s8 }
  0x4a   : > { %s734_s13 = scalar_lea.hbm %s1277_s0, 256  ;;  %p735_p0 = scmp.lt.u32.totalorder %s1120_s27, %s1277_s0 }
  0x4b   : > { %p732_p1 = pnand %p730_p8, %p1085_p9  ;;  %p736_p4 = scmp.lt.u32.totalorder %s734_s13, %s729_s8 }
  0x4c   : > { %p738_p10 = scmp.lt.u32.totalorder %s729_s8, %s1120_s27 }
  0x4d   : > { %p733_p3 = pneg %p732_p1  ;;  %p737_p6 = por %p736_p4, %p735_p0 }
  0x4f   : > { %p739_p12 = por %p738_p10, %p737_p6 }
  0x51   : > { %p740_p13 = pnand %p739_p12, %p733_p3 }
  0x53   : > { %743 = shalt.err (!%p740_p13)
}
  0x54   : > { %s744_s30 = scalar_lea.vmem %s220_s6, 128  ;;  %s934_s22 = smov [#allocation2]  }
  0x55   : > { %p745_p2 = scmp.ne.s32.totalorder %s220_s6, %s744_s30  ;;  %s749_s20 = sshll.u32 %s934_s22, 4  ;;  %s750_s20 = int_to_ptr.vmem [resolvable:$false] %s749_s20 }
  0x56   : > { %s751_s1 = scalar_lea.vmem %s750_s20, 256  ;;  %p752_p1 = scmp.lt.s32.totalorder %s220_s6, %s750_s20 }
  0x57   : > { %p747_p7 = pnand %p745_p2, %p1085_p9  ;;  %p753_p11 = scmp.lt.s32.totalorder %s751_s1, %s744_s30 }
  0x59   : > { %p748_p8 = pneg %p747_p7  ;;  %p754_p5 = por %p753_p11, %p752_p1 }
  0x5b   : > { %p755_p0 = pnand %p754_p5, %p748_p8 }
  0x5d   : > { %758 = shalt.err (!%p755_p0)
}
  0x5e   : > { %p1308_p4 = scmp.ne.s32.totalorder %s1302_s25, 0  ;;  %s1146_s8 = scalar_lea.hbm %s1279_s2, %s1056_s14 }
  0x5f   : > { %s251_s20 = scalar_lea.vmem [#allocation7], %s1060_s18  ;;  %s759_s28 = scalar_lea.hbm %s1146_s8, 128 }
  0x60   : > { %610 = dma.hbm_to_vmem [thread:$0]  (!%p1308_p4), %s1120_s27, 128, %s220_s6, %s206_s7  }
  0x61   : > { %s261_s13 = sshll.u32 %s251_s20, 4  ;;  %p760_p5 = scmp.ne.s32.totalorder %s1146_s8, %s759_s28  ;;  %s262_s13 = int_to_ptr.vmem [resolvable:$true] %s261_s13 }
  0x62   : > { %s764_s27 = scalar_lea.hbm %s1279_s2, 256  ;;  %p765_p6 = scmp.lt.u32.totalorder %s1146_s8, %s1279_s2 }
  0x63   : > { %p762_p11 = pnand %p760_p5, %p1085_p9  ;;  %p766_p10 = scmp.lt.u32.totalorder %s764_s27, %s759_s28 }
  0x64   : > { %p768_p13 = scmp.lt.u32.totalorder %s759_s28, %s1146_s8 }
  0x65   : > { %p763_p3 = pneg %p762_p11  ;;  %p767_p12 = por %p766_p10, %p765_p6 }
  0x67   : > { %p769_p2 = por %p768_p13, %p767_p12 }
  0x69   : > { %p770_p7 = pnand %p769_p2, %p763_p3 }
  0x6b   : > { %773 = shalt.err (!%p770_p7)
}
  0x6c   : > { %s774_s14 = scalar_lea.vmem %s262_s13, 128  ;;  %s935_s18 = smov [#allocation7]  }
  0x6d   : > { %p775_p8 = scmp.ne.s32.totalorder %s262_s13, %s774_s14  ;;  %s779_s1 = sshll.u32 %s935_s18, 4  ;;  %s780_s1 = int_to_ptr.vmem [resolvable:$false] %s779_s1 }
  0x6e   : > { %s781_s17 = scalar_lea.vmem %s780_s1, 256  ;;  %p782_p5 = scmp.lt.s32.totalorder %s262_s13, %s780_s1 }
  0x6f   : > { %p777_p1 = pnand %p775_p8, %p1085_p9  ;;  %p783_p11 = scmp.lt.s32.totalorder %s781_s17, %s774_s14 }
  0x71   : > { %p778_p0 = pneg %p777_p1  ;;  %p784_p4 = por %p783_p11, %p782_p5 }
  0x73   : > { %p785_p6 = pnand %p784_p4, %p778_p0 }
  0x75   : > { %788 = shalt.err (!%p785_p6)
}
  0x76   : > { %p1309_p10 = scmp.ne.s32.totalorder %s1302_s25, 0  ;;  %p1310_p3 = scmp.ne.s32.totalorder %s1306_s10, 0 }
  0x77   : > { %s272_s26 = sand.u32 (!%p1310_p3), 1, %s915_s19   ;;  %p1311_p9 = scmp.ne.s32.totalorder (!%p1310_p3), %s1297_s5, 0 }
  0x78   : > { %616 = dma.hbm_to_vmem [thread:$0]  (!%p1309_p10), %s1146_s8, 128, %s262_s13, %s1079_s29  }
  0x79   : > { %270 = sbr.rel (%p1310_p3) target bundleno = 185 (0xb9), region = 32  ;;  %s583_s9 = sshll.u32 (!%p1310_p3), %s272_s26, 3 }
  0x7a   : > { %s273_s20 = scalar_lea.sflag (!%p1310_p3), [#allocation3], %s272_s26  ;;  %s276_s28 = scalar_lea.vmem (!%p1310_p3), [#allocation2], %s583_s9 }
  0x80   : > { %882 = dma.done.wait (%p1311_p9), %s273_s20, 128  }
  0x81   : > { %884 = vsyncadd (%p1311_p9), %s273_s20, 4294967168  ;;  %s281_s25 = sand.u32 1, %s1007_s24   ;;  %s285_s22 = scalar_lea.vmem [#allocation5], %s583_s9 }
  0x82   : > { %s282_s30 = scalar_lea.sflag [#allocation6], %s281_s25 }
  0x83   : > { %886 = dma.done.wait (%p1311_p9), %s282_s30, 256  }
  0x84   : > { %888 = vsyncadd (%p1311_p9), %s282_s30, 4294967040  ;;  %v351_v0 = vlaneseq  ;;  %s588_s29 = sshll.u32 %s923_s21, 10  ;;  %s1181_s10 = sand.u32 1, %s903_s16   ;;  %v361_v7 = vld [vmem:[%s276_s28] sm:$0xff]  ;;  %v374_v8 = vld [vmem:[%s285_s22] sm:$0xff] }
  0x85   : > { %v354_v2 = vstv %s588_s29  ;;  %s586_s24 = sshll.u32 %s1181_s10, 3  ;;  %s294_s8 = scalar_lea.vmem [#allocation7], %s583_s9 }
  0x86   : > { %v352_v1 = vshrl.u32 %v351_v0, 7  ;;  %v357_v4 = vand.u32 127, %v351_v0  ;;  %v360_v6 = vld [vmem:[%s294_s8] sm:$0xff]  ;;  %s593_s5 = sshll.u32 %s923_s21, 7  ;;  %s326_s13 = scalar_lea.vmem [#allocation8], %s586_s24 }
  0x87   : > { %v362_v10 = vsub.f32 %v361_v7, %v360_v6  ;;  %v375_v11 = vsub.f32 %v374_v8, %v360_v6  ;;  %s406_s27 = sshll.u32 %s326_s13, 4  ;;  %s333_s6 = scalar_lea.vmem [#allocation9], %s586_s24  ;;  %s1192_s27 = int_to_ptr.vmem [resolvable:$true] %s406_s27 }
  0x88   : > { %v353_v3 = vmul.u32 128, %v352_v1  ;;  %s419_s7 = sshll.u32 %s333_s6, 4  ;;  %s1189_s1 = scalar_lea.hbm %s1280_s3, %s593_s5  ;;  %s1199_s7 = int_to_ptr.vmem [resolvable:$true] %s419_s7 }
  0x89   : > { %v363_v12 = vand.u32 2147483647, %v362_v10  ;;  %v365_v13 = vmul.f32 0.5, %v362_v10  ;;  %v376_v14 = vand.u32 2147483647, %v375_v11  ;;  %v378_v15 = vmul.f32 0.5, %v375_v11  ;;  %s1197_s26 = scalar_lea.hbm %s1281_s4, %s593_s5 }
  0x8a   : > { %v355_v5 = vadd.s32 %v354_v2, %v353_v3  ;;  %s388_s9 = scalar_lea.sflag [#allocation4], %s1181_s10  ;;  %s789_s20 = scalar_lea.vmem %s1192_s27, 128 }
  0x8b   : > { %vm364_vm1 = vcmp.lt.f32.partialorder %v363_v12, 1.0  ;;  %v366_v16 = vmul.f32 %v365_v13, %v362_v10  ;;  %v589_v17 = vadd.f32 -0.5, %v363_v12  ;;  %vm377_vm2 = vcmp.lt.f32.partialorder %v376_v14, 1.0  ;;  %p790_p4 = scmp.ne.s32.totalorder %s1192_s27, %s789_s20  ;;  %p1312_p12 = scmp.ne.s32.totalorder %s1300_s11, 0 }
  0x8c   : > { %v358_v9 = vadd.s32 %v357_v4, %v355_v5  ;;  %v379_v18 = vmul.f32 %v378_v15, %v375_v11  ;;  %v590_v19 = vadd.f32 -0.5, %v376_v14  ;;  %s936_s28 = smov [#allocation8]  }
  0x8d   : > { %v368_v20 = vsel %vm364_vm1, %v366_v16, %v589_v17  ;;  %p791_p13 = pnand %p790_p4, %p1312_p12  ;;  %s793_s25 = sshll.u32 %s936_s28, 4  ;;  %s794_s25 = int_to_ptr.vmem [resolvable:$false] %s793_s25 }
  0x8e   : > { %vm359_vm0 = vcmp.lt.s32.totalorder %v358_v9, 1536  ;;  %v381_v22 = vsel %vm377_vm2, %v379_v18, %v590_v19  ;;  %s795_s30 = scalar_lea.vmem %s794_s25, 256  ;;  %p796_p7 = scmp.lt.s32.totalorder %s1192_s27, %s794_s25 }
  0x8f   : > { %v369_v21 = vsel %vm359_vm0, %v368_v20, 0.0  ;;  %v382_v23 = vsel %vm359_vm0, %v381_v22, 0.0  ;;  %p792_p2 = pneg %p791_p13  ;;  %p797_p8 = scmp.lt.s32.totalorder %s795_s30, %s789_s20 }
  0x90   : > { %373 = vst [vmem:[%s326_s13] sm:$0xff] %v369_v21  ;;  %386 = vst [vmem:[%s333_s6] sm:$0xff] %v382_v23 }
  0x91   : > { %p798_p1 = por %p797_p8, %p796_p7 }
  0x93   : > { %p799_p0 = pnand %p798_p1, %p792_p2 }
  0x95   : > { %802 = shalt.err (!%p799_p0)
}
  0x96   : > { %s803_s22 = scalar_lea.hbm %s1189_s1, 128  ;;  %s807_s8 = scalar_lea.hbm %s1280_s3, 256 }
  0x97   : > { %p804_p5 = scmp.ne.s32.totalorder %s1189_s1, %s803_s22  ;;  %p808_p10 = scmp.lt.u32.totalorder %s1189_s1, %s1280_s3 }
  0x98   : > { %p809_p3 = scmp.lt.u32.totalorder %s807_s8, %s803_s22  ;;  %p811_p4 = scmp.lt.u32.totalorder %s803_s22, %s1189_s1 }
  0x99   : > { %p805_p11 = pnand %p804_p5, %p1312_p12 }
  0x9a   : > { %p810_p9 = por %p809_p3, %p808_p10 }
  0x9b   : > { %p806_p6 = pneg %p805_p11 }
  0x9c   : > { %p812_p13 = por %p811_p4, %p810_p9 }
  0x9e   : > { %p813_p2 = pnand %p812_p13, %p806_p6 }
  0xa0   : > { %816 = shalt.err (!%p813_p2)
}
  0xa1   : > { %603 = dma.vmem_to_hbm [thread:$0]  (%p1312_p12), %s1192_s27, 128, %s1189_s1, %s388_s9  }
  0xa2   : > { %s393_s6 = scalar_lea.sflag [#allocation10], %s1181_s10  ;;  %s817_s14 = scalar_lea.vmem %s1199_s7, 128 }
  0xa3   : > { %p818_p7 = scmp.ne.s32.totalorder %s1199_s7, %s817_s14  ;;  %s937_s18 = smov [#allocation9]  }
  0xa4   : > { %s821_s21 = sshll.u32 %s937_s18, 4  ;;  %s822_s21 = int_to_ptr.vmem [resolvable:$false] %s821_s21 }
  0xa5   : > { %p819_p8 = pnand %p818_p7, %p1312_p12  ;;  %s823_s17 = scalar_lea.vmem %s822_s21, 256 }
  0xa6   : > { %p824_p0 = scmp.lt.s32.totalorder %s1199_s7, %s822_s21  ;;  %p825_p5 = scmp.lt.s32.totalorder %s823_s17, %s817_s14 }
  0xa7   : > { %p820_p1 = pneg %p819_p8 }
  0xa8   : > { %p826_p11 = por %p825_p5, %p824_p0 }
  0xaa   : > { %p827_p6 = pnand %p826_p11, %p820_p1 }
  0xac   : > { %830 = shalt.err (!%p827_p6)
}
  0xad   : > { %s831_s10 = scalar_lea.hbm %s1197_s26, 128  ;;  %s835_s9 = scalar_lea.hbm %s1281_s4, 256 }
  0xae   : > { %p832_p10 = scmp.ne.s32.totalorder %s1197_s26, %s831_s10  ;;  %p836_p4 = scmp.lt.u32.totalorder %s1197_s26, %s1281_s4 }
  0xaf   : > { %p837_p13 = scmp.lt.u32.totalorder %s835_s9, %s831_s10  ;;  %p839_p7 = scmp.lt.u32.totalorder %s831_s10, %s1197_s26 }
  0xb0   : > { %p833_p3 = pnand %p832_p10, %p1312_p12 }
  0xb1   : > { %p838_p2 = por %p837_p13, %p836_p4 }
  0xb2   : > { %p834_p9 = pneg %p833_p3 }
  0xb3   : > { %p840_p8 = por %p839_p7, %p838_p2 }
  0xb5   : > { %p841_p1 = pnand %p840_p8, %p834_p9 }
  0xb7   : > { %844 = shalt.err (!%p841_p1)
}
  0xb8   : > { %604 = dma.vmem_to_hbm [thread:$0]  (%p1312_p12), %s1199_s7, 128, %s1197_s26, %s393_s6  }
  0xb9 PF: > { %s431_s25 = sand.u32 1, %s899_s15   ;;  %p1313_p0 = scmp.ne.s32.totalorder %s1301_s12, 0 }
  0xba   : > { %p1314_p5 = scmp.ge.s32.totalorder %s931_s23, 2  ;;  %s432_s30 = scalar_lea.sflag [#allocation4], %s431_s25 }
  0xbc   : > { %p618_p11 = pnand %p1314_p5, %p1313_p0 }
  0xbe   : > { %890 = dma.done.wait (!%p618_p11), %s432_s30, 128  }
  0xbf   : > { %892 = vsyncadd (!%p618_p11), %s432_s30, 4294967168  ;;  %s441_s22 = scalar_lea.sflag [#allocation10], %s431_s25 }
  0xc0   : > { %894 = dma.done.wait (!%p618_p11), %s441_s22, 128  }
  0xc1   : > { %896 = vsyncadd (!%p618_p11), %s441_s22, 4294967168  ;;  %s27_s23 = sadd.s32 1, %s931_s23   ;;  %s1315_s11 = sld [smem:[#allocation15_spill]] }
  0xc2   : > { %p24_p6 = scmp.ge.s32.totalorder %s27_s23, 4   ;;  %s1316_s17 = sld [smem:[#allocation19_spill]] }
  0xc3   : > { %s1317_s7 = sld [smem:[#allocation16_spill]]  ;;  %s1318_s20 = sld [smem:[#allocation20_spill]] }
  0xc4   : > { %s1319_s21 = sld [smem:[#allocation17_spill]]  ;;  %s1320_s22 = sld [smem:[#allocation18_spill]] }
  0xc5   : > { %s1321_s15 = smov %s903_s16  ;;  %s1323_s18 = smov %s915_s19 }
  0xc6   :  { %26 = sbr.rel (!%p24_p6) target bundleno = 14 (0xe), region = 122 }
  0xc7   : > { %s1322_s16 = smov %s1315_s11 }
  0xc9   : > { %s1324_s19 = smov %s1317_s7 }
  0xcd   :  { %446 = vsyncpa [#allocation3], 1 }
  0xce   :  { %448 = vsyncpa [#allocation3 + $0x1], 1 }
  0xcf   :  { %449 = vsyncpa [#allocation6], 1 }
  0xd0   :  { %451 = vsyncpa [#allocation6 + $0x1], 1 }
  0xd1   :  { %452 = vsyncpa [#allocation4], 1 }
  0xd2   :  { %454 = vsyncpa [#allocation4 + $0x1], 1 }
  0xd3   :  { %455 = vsyncpa [#allocation10], 1 }
  0xd4   :  { %457 = vsyncpa [#allocation10 + $0x1], 1 }

</bundles_post_ra>
